<compile_context>
chip_gen: v7x
topology: tpu7x:2x2x1
jax: 0.10.0
libtpu: 0.0.40
codegen_flags: <defaults>
</compile_context>

<pallas_src>
import jax
import jax.numpy as jnp
from jax.experimental import pallas as pl
from jax.experimental.pallas import tpu as pltpu

IN_DIM = 784                 # fixed by nn.Linear(784, hidden_dim)
HIDDEN_DIM = 128             # module arg (small for this synthetic run)
LATENT_DIM = 32              # module arg
BATCH = 8
OUT_PAD = 128                # lane-dense fused [mu | logvar | 0] head width
BIAS_ROWS = 16               # one bf16 sublane tile -> sections stay tile-aligned

# Row offsets inside the single packed bf16 weight buffer (width 128 == H):
ROW_B1 = IN_DIM                       # 784 : b1 rows start (784 % 16 == 0)
ROW_WH = ROW_B1 + BIAS_ROWS           # 800 : fused head weights start
ROW_BH = ROW_WH + HIDDEN_DIM          # 928 : fused head bias rows start
W_ROWS = ROW_BH + BIAS_ROWS           # 944 : total rows
# NOTE: the merged packing assumes HIDDEN_DIM == OUT_PAD == 128.


def _encoder_kernel(x_ref, w_ref, out_ref):
    # --- Linear(784, H) + ReLU: bf16 operands, f32 MXU accumulation ---------
    x = x_ref[...].astype(jnp.bfloat16)                          # (bm, 784)
    w1 = w_ref[:ROW_B1, :]                                       # (784, 128) bf16
    b1 = w_ref[ROW_B1:ROW_WH, :].astype(jnp.float32)[:1, :]      # (1, 128)
    emb = jnp.dot(x, w1, preferred_element_type=jnp.float32) + b1
    emb = jnp.maximum(emb, 0.0)                                  # (bm, 128) f32

    # --- fused [mu | logvar | 0-pad] head: one (H, 128) lane-dense matmul ---
    wh = w_ref[ROW_WH:ROW_BH, :].astype(jnp.float32)             # (128, 128)
    bh = w_ref[ROW_BH:, :].astype(jnp.float32)[:1, :]            # (1, 128)
    heads = jnp.dot(emb, wh, preferred_element_type=jnp.float32) + bh  # (bm, 128)

    # --- softmax over logvar lanes [L, 2L); mu lanes pass through; ----------
    # --- pad lanes [2L, 128) are exactly zero (zero weights + zero bias). ---
    lane = jax.lax.broadcasted_iota(jnp.int32, heads.shape, 1)
    is_var = jnp.logical_and(lane >= LATENT_DIM, lane < 2 * LATENT_DIM)

    lv_masked = jnp.where(is_var, heads, -jnp.inf)
    m = jnp.max(lv_masked, axis=-1, keepdims=True)               # max over var lanes
    e = jnp.where(is_var, jnp.exp(heads - m), 0.0)               # select, NOT mask-mul
    s = jnp.sum(e, axis=-1, keepdims=True)
    sm = e * pl.reciprocal(s, approx=False)                      # exact divide
    logvar = sm * jnp.float32(LATENT_DIM) + jnp.float32(1e-6)

    out_ref[...] = jnp.where(is_var, logvar, heads).astype(out_ref.dtype)


def pack_params(params):
    """Pack PyTorch-style params into one bf16 buffer (W_ROWS, 128)."""
    w1, b1, wmu, bmu, wv, bv = params
    pad = OUT_PAD - 2 * LATENT_DIM
    b1_rows = jnp.broadcast_to(b1.reshape(1, HIDDEN_DIM), (BIAS_ROWS, HIDDEN_DIM))
    w_heads = jnp.pad(jnp.concatenate([wmu, wv], axis=1), ((0, 0), (0, pad)))   # (H, 128)
    b_heads = jnp.pad(jnp.concatenate([bmu, bv], axis=1), ((0, 0), (0, pad)))   # (1, 128)
    b_heads_rows = jnp.broadcast_to(b_heads, (BIAS_ROWS, OUT_PAD))
    w_packed = jnp.concatenate([w1, b1_rows, w_heads, b_heads_rows], axis=0)
    return w_packed.astype(jnp.bfloat16)                                        # (944, 128)


def mnist_encoder_forward(x_nchw, w_packed):
    """x_nchw: (B, 1, 28, 28) float32.  Returns (mu, logvar), each (B, L)."""
    B = x_nchw.shape[0]
    x_flat = x_nchw.reshape(B, IN_DIM)      # free reshape; cast happens in-kernel

    bm = B if B <= 256 else 256             # batch tile (parallel axis for v7x)
    assert B % bm == 0
    grid = (B // bm,)

    out = pl.pallas_call(
        _encoder_kernel,
        out_shape=jax.ShapeDtypeStruct((B, OUT_PAD), jnp.float32),
        grid=grid,
        in_specs=[
            pl.BlockSpec((bm, IN_DIM), lambda i: (i, 0)),
            pl.BlockSpec((W_ROWS, OUT_PAD), lambda i: (0, 0)),   # weight stays resident
        ],
        out_specs=pl.BlockSpec((bm, OUT_PAD), lambda i: (i, 0)),
        compiler_params=pltpu.CompilerParams(
            dimension_semantics=("parallel",),
            vmem_limit_bytes=16 << 20),
    )(x_flat, w_packed)

    return out[:, :LATENT_DIM], out[:, LATENT_DIM:2 * LATENT_DIM]


def init_params(key):
    """Deterministic synthetic params (PyTorch Linear shapes, pre-transposed)."""
    k1, k2, k3, k4, k5, k6 = jax.random.split(key, 6)
    s1 = 1.0 / jnp.sqrt(IN_DIM)
    s2 = 1.0 / jnp.sqrt(HIDDEN_DIM)
    w1 = jax.random.uniform(k1, (IN_DIM, HIDDEN_DIM), jnp.float32, -s1, s1)
    b1 = jax.random.uniform(k2, (1, HIDDEN_DIM), jnp.float32, -s1, s1)
    wmu = jax.random.uniform(k3, (HIDDEN_DIM, LATENT_DIM), jnp.float32, -s2, s2)
    bmu = jax.random.uniform(k4, (1, LATENT_DIM), jnp.float32, -s2, s2)
    wv = jax.random.uniform(k5, (HIDDEN_DIM, LATENT_DIM), jnp.float32, -s2, s2)
    bv = jax.random.uniform(k6, (1, LATENT_DIM), jnp.float32, -s2, s2)
    return (w1, b1, wmu, bmu, wv, bv)


def _reference(x_nchw, w_packed):
    """Pure-JAX reference mirroring the kernel's (bf16-weight) numerics."""
    wp = w_packed.astype(jnp.float32)
    w1 = wp[:ROW_B1]
    b1 = wp[ROW_B1:ROW_B1 + 1]
    wh = wp[ROW_WH:ROW_BH]
    bh = wp[ROW_BH:ROW_BH + 1]
    B = x_nchw.shape[0]
    x = x_nchw.reshape(B, IN_DIM).astype(jnp.bfloat16).astype(jnp.float32)
    emb = jnp.maximum(x @ w1 + b1, 0.0)
    heads = emb @ wh + bh
    mu = heads[:, :LATENT_DIM]
    lv = heads[:, LATENT_DIM:2 * LATENT_DIM]
    logvar = jax.nn.softmax(lv, axis=-1) * LATENT_DIM + 1e-6
    return mu, logvar


if __name__ == "__main__":
    key = jax.random.PRNGKey(0)
    kx, kp = jax.random.split(key)
    x = jax.random.normal(kx, (BATCH, 1, 28, 28), jnp.float32)
    params = init_params(kp)
    w_packed = pack_params(params)

    mu, logvar = jax.jit(mnist_encoder_forward)(x, w_packed)
    jax.block_until_ready((mu, logvar))

    mu_ref, logvar_ref = _reference(x, w_packed)
    assert mu.shape == (BATCH, LATENT_DIM) and logvar.shape == (BATCH, LATENT_DIM)
    assert jnp.allclose(mu, mu_ref, atol=1e-4, rtol=1e-4)
    assert jnp.allclose(logvar, logvar_ref, atol=1e-4, rtol=1e-4)
    print("KERNEL_OK")
</pallas_src>

<mosaic_0001>
module attributes {stable_mosaic.version = 11 : i64} {
  func.func @_encoder_kernel(%arg0: i32, %arg1: memref<8x784xf32, #tpu.memory_space<vmem>>, %arg2: memref<944x128xbf16, #tpu.memory_space<vmem>>, %arg3: memref<8x128xf32, #tpu.memory_space<vmem>>) attributes {dimension_semantics = [#tpu.dimension_semantics<parallel>], iteration_bounds = array<i64: 1>, scalar_prefetch = 0 : i64, scratch_operands = 0 : i64, tpu.core_type = #tpu.core_type<tc>, window_params = [{transform_indices = @transform_0, window_bounds = array<i64: 8, 784>}, {pipeline_mode = #tpu.pipeline_mode<synchronous>, transform_indices = @transform_1, window_bounds = array<i64: 944, 128>}, {transform_indices = @transform_2, window_bounds = array<i64: 8, 128>}]} {
    %c0 = arith.constant 0 : index
    %c0_0 = arith.constant 0 : index
    %0 = vector.load %arg1[%c0, %c0_0] : memref<8x784xf32, #tpu.memory_space<vmem>>, vector<8x784xf32>
    %1 = arith.truncf %0 : vector<8x784xf32> to vector<8x784xbf16>
    %c0_1 = arith.constant 0 : index
    %c0_2 = arith.constant 0 : index
    %2 = vector.load %arg2[%c0_1, %c0_2] : memref<944x128xbf16, #tpu.memory_space<vmem>>, vector<784x128xbf16>
    %c784 = arith.constant 784 : index
    %c0_3 = arith.constant 0 : index
    %3 = vector.load %arg2[%c784, %c0_3] : memref<944x128xbf16, #tpu.memory_space<vmem>>, vector<16x128xbf16>
    %4 = arith.extf %3 : vector<16x128xbf16> to vector<16x128xf32>
    %5 = vector.extract_strided_slice %4 {offsets = [0, 0], sizes = [1, 128], strides = [1, 1]} : vector<16x128xf32> to vector<1x128xf32>
    %cst = arith.constant dense<0.000000e+00> : vector<8x128xf32>
    %6 = tpu.matmul %1, %2, %cst {dimension_numbers = #tpu.dot_dimension_numbers<[1], [0], [0], [1], [0, 0, 1, 1], [], []>} : vector<8x784xbf16>, vector<784x128xbf16>, vector<8x128xf32> -> vector<8x128xf32>
    %7 = vector.broadcast %5 : vector<1x128xf32> to vector<8x128xf32>
    %8 = arith.addf %6, %7 : vector<8x128xf32>
    %cst_4 = arith.constant 0.000000e+00 : f32
    %9 = vector.broadcast %cst_4 : f32 to vector<8x128xf32>
    %10 = arith.maximumf %8, %9 : vector<8x128xf32>
    %c800 = arith.constant 800 : index
    %c0_5 = arith.constant 0 : index
    %11 = vector.load %arg2[%c800, %c0_5] : memref<944x128xbf16, #tpu.memory_space<vmem>>, vector<128x128xbf16>
    %12 = arith.extf %11 : vector<128x128xbf16> to vector<128x128xf32>
    %c928 = arith.constant 928 : index
    %c0_6 = arith.constant 0 : index
    %13 = vector.load %arg2[%c928, %c0_6] : memref<944x128xbf16, #tpu.memory_space<vmem>>, vector<16x128xbf16>
    %14 = arith.extf %13 : vector<16x128xbf16> to vector<16x128xf32>
    %15 = vector.extract_strided_slice %14 {offsets = [0, 0], sizes = [1, 128], strides = [1, 1]} : vector<16x128xf32> to vector<1x128xf32>
    %cst_7 = arith.constant dense<0.000000e+00> : vector<8x128xf32>
    %16 = tpu.matmul %10, %12, %cst_7 {dimension_numbers = #tpu.dot_dimension_numbers<[1], [0], [0], [1], [0, 0, 1, 1], [], []>} : vector<8x128xf32>, vector<128x128xf32>, vector<8x128xf32> -> vector<8x128xf32>
    %17 = vector.broadcast %15 : vector<1x128xf32> to vector<8x128xf32>
    %18 = arith.addf %16, %17 : vector<8x128xf32>
    %19 = tpu.iota {dimensions = array<i32: 1>} : vector<8x128xi32>
    %c32_i32 = arith.constant 32 : i32
    %20 = vector.broadcast %c32_i32 : i32 to vector<8x128xi32>
    %21 = arith.cmpi sge, %19, %20 : vector<8x128xi32>
    %c64_i32 = arith.constant 64 : i32
    %22 = vector.broadcast %c64_i32 : i32 to vector<8x128xi32>
    %23 = arith.cmpi slt, %19, %22 : vector<8x128xi32>
    %24 = arith.andi %21, %23 : vector<8x128xi1>
    %cst_8 = arith.constant 0xFF800000 : f32
    %25 = vector.broadcast %cst_8 : f32 to vector<8x128xf32>
    %26 = arith.select %24, %18, %25 : vector<8x128xi1>, vector<8x128xf32>
    %cst_9 = arith.constant dense<0xFF800000> : vector<8xf32>
    %27 = vector.multi_reduction <maximumf>, %26, %cst_9 [1] : vector<8x128xf32> to vector<8xf32>
    %28 = vector.shape_cast %27 : vector<8xf32> to vector<8x1xf32>
    %29 = vector.broadcast %28 : vector<8x1xf32> to vector<8x128xf32>
    %30 = arith.subf %18, %29 : vector<8x128xf32>
    %31 = math.exp %30 : vector<8x128xf32>
    %cst_10 = arith.constant 0.000000e+00 : f32
    %32 = vector.broadcast %cst_10 : f32 to vector<8x128xf32>
    %33 = arith.select %24, %31, %32 : vector<8x128xi1>, vector<8x128xf32>
    %cst_11 = arith.constant dense<0.000000e+00> : vector<8xf32>
    %34 = vector.multi_reduction <add>, %33, %cst_11 [1] : vector<8x128xf32> to vector<8xf32>
    %35 = vector.shape_cast %34 : vector<8xf32> to vector<8x1xf32>
    %36 = tpu.reciprocal %35 : vector<8x1xf32> -> vector<8x1xf32>
    %37 = vector.broadcast %36 : vector<8x1xf32> to vector<8x128xf32>
    %38 = arith.mulf %33, %37 : vector<8x128xf32>
    %cst_12 = arith.constant 3.200000e+01 : f32
    %39 = vector.broadcast %cst_12 : f32 to vector<8x128xf32>
    %40 = arith.mulf %38, %39 : vector<8x128xf32>
    %cst_13 = arith.constant 9.99999997E-7 : f32
    %41 = vector.broadcast %cst_13 : f32 to vector<8x128xf32>
    %42 = arith.addf %40, %41 : vector<8x128xf32>
    %43 = arith.select %24, %42, %18 : vector<8x128xi1>, vector<8x128xf32>
    %c0_14 = arith.constant 0 : index
    %c0_15 = arith.constant 0 : index
    %44 = vector.load %arg3[%c0_14, %c0_15] : memref<8x128xf32, #tpu.memory_space<vmem>>, vector<8x128xf32>
    tpu.vector_store %arg3[%c0_14, %c0_15], %43 {strides = array<i32>} : memref<8x128xf32, #tpu.memory_space<vmem>>, vector<8x128xf32>,
    return
  }
  func.func @transform_0(%arg0: i32) -> (i32, i32) {
    %c0_i32 = arith.constant 0 : i32
    %c0_i32_0 = arith.constant 0 : i32
    return %arg0, %c0_i32 : i32, i32
  }
  func.func @transform_1(%arg0: i32) -> (i32, i32) {
    %c0_i32 = arith.constant 0 : i32
    %c0_i32_0 = arith.constant 0 : i32
    %c0_i32_1 = arith.constant 0 : i32
    return %c0_i32, %c0_i32_0 : i32, i32
  }
  func.func @transform_2(%arg0: i32) -> (i32, i32) {
    %c0_i32 = arith.constant 0 : i32
    %c0_i32_0 = arith.constant 0 : i32
    return %arg0, %c0_i32 : i32, i32
  }
}

</mosaic_0001>

<bundles_post_ra>
// kernel: mnist_encoder_forward.1
= control target key start
LH: loop header
LB: loop body
LE: loop exit
PB: predicated region body
PF: predicated region fallthrough
CT: control target
= control target key end

     0   :  { %v1017_v44 = vmov 0.0   ;;  %vm1018_vm0 = vmmov 0   ;;  %vm424_vm1 = vcmask 130048   ;;  %s1245_s1 = inlined_call_operand.vmem [shape: bf16[944,128], index: 1, kind: input, shape index: {}]   ;;  %s1246_s0 = inlined_call_operand.vmem [shape: f32[8,784], index: 0, kind: input, shape index: {}]   ;;  %s1247_s2 = inlined_call_operand.vmem [shape: f32[8,128], index: 2, kind: output, shape index: {}]  }
   0x1   :  { %v964_v0 = vld [vmem:[%s1245_s1 + $0x40] sm:$0xff]   ;;  %v968_v4 = vld [vmem:[%s1245_s1 + $0x48] sm:$0xff]   ;;  %v972_v8 = vld [vmem:[%s1245_s1 + $0x50] sm:$0xff]  }
   0x2   :  { %v965_v1 = vld [vmem:[%s1245_s1] sm:$0xff]   ;;  %811 = vmatprep.subr.bf16.mxu0 %v964_v0  ;;  %v969_v5 = vld [vmem:[%s1245_s1 + $0x8] sm:$0xff]   ;;  %v973_v9 = vld [vmem:[%s1245_s1 + $0x10] sm:$0xff]  }
   0x3   :  { %v966_v2 = vld [vmem:[%s1245_s1 + $0xc0] sm:$0xff]   ;;  %812 = vmatpush3.bf16.msra.mxu0 %v965_v1  ;;  %v970_v6 = vld [vmem:[%s1245_s1 + $0xc8] sm:$0xff]   ;;  %v974_v10 = vld [vmem:[%s1245_s1 + $0xd0] sm:$0xff]   ;;  %v1019_v1 = vmov 0.0|0.0  }
   0x4   :  { %v967_v3 = vld [vmem:[%s1245_s1 + $0x80] sm:$0xff]   ;;  %833 = vmatprep.subr.bf16.mxu1 %v966_v2  ;;  %813 = vmatprep.subr.bf16.mxu0 %v968_v4  ;;  %v971_v7 = vld [vmem:[%s1245_s1 + $0x88] sm:$0xff]   ;;  %v975_v11 = vld [vmem:[%s1245_s1 + $0x90] sm:$0xff]  }
   0x5   :  { %834 = vmatpush3.bf16.msra.mxu1 %v967_v3  ;;  %v976_v12 = vld [vmem:[%s1245_s1 + $0x58] sm:$0xff]   ;;  %v980_v16 = vld [vmem:[%s1245_s1 + $0x60] sm:$0xff]   ;;  %v984_v20 = vld [vmem:[%s1245_s1 + $0x68] sm:$0xff]  }
   0x6   :  { %835 = vmatprep.subr.bf16.mxu1 %v970_v6  ;;  %v977_v13 = vld [vmem:[%s1245_s1 + $0x18] sm:$0xff]   ;;  %v981_v17 = vld [vmem:[%s1245_s1 + $0x20] sm:$0xff]   ;;  %v985_v21 = vld [vmem:[%s1245_s1 + $0x28] sm:$0xff]  }
   0x7   :  { %814 = vmatpush3.bf16.msra.mxu0 %v969_v5  ;;  %v978_v14 = vld [vmem:[%s1245_s1 + $0xd8] sm:$0xff]   ;;  %v982_v18 = vld [vmem:[%s1245_s1 + $0xe0] sm:$0xff]   ;;  %v986_v22 = vld [vmem:[%s1245_s1 + $0xe8] sm:$0xff]  }
   0x8   :  { %815 = vmatprep.subr.bf16.mxu0 %v972_v8  ;;  %v979_v15 = vld [vmem:[%s1245_s1 + $0x98] sm:$0xff]   ;;  %v983_v19 = vld [vmem:[%s1245_s1 + $0xa0] sm:$0xff]   ;;  %v987_v23 = vld [vmem:[%s1245_s1 + $0xa8] sm:$0xff]  }
   0x9   :  { %836 = vmatpush3.bf16.msra.mxu1 %v971_v7  ;;  %v988_v24 = vld [vmem:[%s1245_s1 + $0x70] sm:$0xff]   ;;  %v992_v28 = vld [vmem:[%s1245_s1 + $0x78] sm:$0xff]   ;;  %v13_v31 = vld [vmem:[%s1246_s0 + $0x8] sm:$0xff]  ;;  %v126_v7 = vlaneseq }
   0xa   :  { %837 = vmatprep.subr.bf16.mxu1 %v974_v10  ;;  %v989_v25 = vld [vmem:[%s1245_s1 + $0x30] sm:$0xff]   ;;  %v993_v29 = vld [vmem:[%s1245_s1 + $0x38] sm:$0xff]   ;;  %v20_v32 = vpack.c.bf16 %v13_v31, %v13_v31  ;;  %v12_v34 = vld [vmem:[%s1246_s0] sm:$0xff] }
   0xb   :  { %816 = vmatpush3.bf16.msra.mxu0 %v973_v9  ;;  %v990_v26 = vld [vmem:[%s1245_s1 + $0xf0] sm:$0xff]   ;;  %v994_v30 = vld [vmem:[%s1245_s1 + $0xf8] sm:$0xff]   ;;  %v19_v35 = vpack.c.bf16 %v12_v34, %v12_v34  ;;  %v996_v36 = vld [vmem:[%s1245_s1 + $0x140] sm:$0xff]   ;;  %v127_v9 = vshrl.u32 %v126_v7, 7 }
   0xc   :  { %817 = vmatprep.subr.bf16.mxu0 %v976_v12  ;;  %v991_v27 = vld [vmem:[%s1245_s1 + $0xb0] sm:$0xff]   ;;  %v995_v33 = vld [vmem:[%s1245_s1 + $0xb8] sm:$0xff]   ;;  %460 = vmatprep.mubr.bf16.mxu0 %v20_v32  ;;  %v997_v39 = vld [vmem:[%s1245_s1 + $0x100] sm:$0xff]  }
   0xd   :  { %838 = vmatpush3.bf16.msra.mxu1 %v975_v11  ;;  %v15_v37 = vld [vmem:[%s1246_s0 + $0x18] sm:$0xff]  ;;  %v14_v40 = vld [vmem:[%s1246_s0 + $0x10] sm:$0xff]  ;;  %v998_v42 = vld [vmem:[%s1245_s1 + $0x148] sm:$0xff]   ;;  %v128_v12 = vsub.s32 0, %v127_v9 }
   0xe   :  { %839 = vmatprep.subr.bf16.mxu1 %v978_v14  ;;  %v22_v38 = vpack.c.bf16 %v15_v37, %v15_v37  ;;  %v21_v41 = vpack.c.bf16 %v14_v40, %v14_v40  ;;  %v999_v43 = vld [vmem:[%s1245_s1 + $0x108] sm:$0xff]   ;;  %v1000_v45 = vld [vmem:[%s1245_s1 + $0x150] sm:$0xff]   ;;  %v1002_v47 = vld [vmem:[%s1245_s1 + $0x158] sm:$0xff]  }
   0xf   :  { %818 = vmatpush3.bf16.msra.mxu0 %v977_v13  ;;  %v1001_v46 = vld [vmem:[%s1245_s1 + $0x110] sm:$0xff]   ;;  %v1003_v48 = vld [vmem:[%s1245_s1 + $0x118] sm:$0xff]   ;;  %v1004_v49 = vld [vmem:[%s1245_s1 + $0x160] sm:$0xff]  }
  0x10   :  { %819 = vmatprep.subr.bf16.mxu0 %v980_v16  ;;  %500 = vmatprep.mubr.bf16.mxu1 %v22_v38  ;;  %v1005_v50 = vld [vmem:[%s1245_s1 + $0x120] sm:$0xff]   ;;  %v1006_v51 = vld [vmem:[%s1245_s1 + $0x168] sm:$0xff]   ;;  %v18_v55 = vld [vmem:[%s1246_s0 + $0x30] sm:$0xff] }
  0x11   :  { %840 = vmatpush3.bf16.msra.mxu1 %v979_v15  ;;  %v1012_v52 = vld [vmem:[%s1245_s1 + $0x180] sm:$0xff]   ;;  %v17_v53 = vld [vmem:[%s1246_s0 + $0x28] sm:$0xff]  ;;  %v25_v57 = vpack.c.bf16 %v18_v55, %v18_v55  ;;  %v1008_v58 = vld [vmem:[%s1245_s1 + $0x170] sm:$0xff]  }
  0x12   :  { %841 = vmatprep.subr.bf16.mxu1 %v982_v18  ;;  %v24_v54 = vpack.c.bf16 %v17_v53, %v17_v53  ;;  %v1007_v56 = vld [vmem:[%s1245_s1 + $0x128] sm:$0xff]   ;;  %v1009_v59 = vld [vmem:[%s1245_s1 + $0x130] sm:$0xff]   ;;  %v1010_v60 = vld [vmem:[%s1245_s1 + $0x178] sm:$0xff]  }
  0x13   :  { %820 = vmatpush3.bf16.msra.mxu0 %v981_v17  ;;  %v1011_v61 = vld [vmem:[%s1245_s1 + $0x138] sm:$0xff]   ;;  %v16_v62 = vld [vmem:[%s1246_s0 + $0x20] sm:$0xff]  ;;  %v803_v0 = vld [vmem:[%s1245_s1 + $0x190] sm:$0xff]  }
  0x14   :  { %821 = vmatprep.subr.bf16.mxu0 %v984_v20  ;;  %v23_v63 = vpack.c.bf16 %v16_v62, %v16_v62  ;;  %v804_v2 = vld [vmem:[%s1245_s1 + $0x198] sm:$0xff]   ;;  %v805_v3 = vld [vmem:[%s1245_s1 + $0x1a0] sm:$0xff]   ;;  %v806_v4 = vld [vmem:[%s1245_s1 + $0x1a8] sm:$0xff]  }
  0x15   :  { %842 = vmatpush3.bf16.msra.mxu1 %v983_v19  ;;  %v807_v5 = vld [vmem:[%s1245_s1 + $0x1b0] sm:$0xff]   ;;  %v808_v6 = vld [vmem:[%s1245_s1 + $0x1b8] sm:$0xff]   ;;  %v809_v8 = vld [vmem:[%s1245_s1 + $0x1c0] sm:$0xff]  }
  0x16   :  { %843 = vmatprep.subr.bf16.mxu1 %v986_v22  ;;  %v810_v10 = vld [vmem:[%s1245_s1 + $0x1c8] sm:$0xff]  }
  0x17   :  { %822 = vmatpush3.bf16.msra.mxu0 %v985_v21  ;;  %v124_v11 = vld [vmem:[%s1245_s1 + $0x188] ss:$72 sps:$4 sm:$0xff]  }
  0x18   :  { %823 = vmatprep.subr.bf16.mxu0 %v988_v24  ;;  %v622_v13 = vunpack.c.h.bf16 %v124_v11  ;;  %v125_v15 = vunpack.c.l.bf16 %v124_v11 }
  0x19   :  { %844 = vmatpush3.bf16.msra.mxu1 %v987_v23 }
  0x1a   :  { %845 = vmatprep.subr.bf16.mxu1 %v990_v26  ;;  %v626_v14 = vrot.slane %v622_v13, %v128_v12  ;;  %v129_v17 = vrot.slane %v125_v15, %v128_v12 }
  0x1b   :  { %824 = vmatpush3.bf16.msra.mxu0 %v989_v25 }
  0x1c   :  { %825 = vmatprep.subr.bf16.mxu0 %v992_v28 }
  0x1d   :  { %846 = vmatpush3.bf16.msra.mxu1 %v991_v27 }
  0x1e   :  { %847 = vmatprep.subr.bf16.mxu1 %v994_v30 }
  0x1f   :  { %826 = vmatpush3.bf16.msra.mxu0 %v993_v29 }
  0x20   :  { %855 = vmatprep.subr.bf16.mxu0 %v996_v36 }
  0x21   :  { %848 = vmatpush3.bf16.msra.mxu1 %v995_v33 }
  0x22   :  { %461 = vmatmul.mubr.bf16.vlgmr.msra.gmra.mrb[0].mxu0 %v19_v35  ;;  %896 = vmatprep.subr.bf16.mxu1 %v1017_v44 }
  0x23   :  { %856 = vmatpush3.bf16.msra.mxu0 %v997_v39  ;;  %540 = vmatprep.mubr.bf16.mxu0 %v24_v54 }
  0x24   :  { %501 = vmatmul.mubr.bf16.vlgmr.msra.gmra.mrb[0].mxu1 %v21_v41  ;;  %857 = vmatprep.subr.bf16.mxu0 %v998_v42  ;;  %v698_v41 = vand.u32 127, %v126_v7 }
  0x25   :  { %898 = vmatprep.mubr.msk.bf16.mxu1 %vm1018_vm0, %v1017_v44  ;;  %897 = vmatpush3.bf16.msra.mxu1 %v1012_v52 }
  0x26   :  { %937 = vmatprep.subr.bf16.mxu1 %v1019_v1  ;;  %vm699_vm2 = vcmp.ge.s32.totalorder %v698_v41, 32  ;;  %vm700_vm3 = vcmp.lt.s32.totalorder %v698_v41, 64 }
  0x27   :  { %858 = vmatpush3.bf16.msra.mxu0 %v999_v43  ;;  %vm1232_vm4 = vmand %vm699_vm2, %vm700_vm3 }
  0x28   :  { %859 = vmatprep.subr.bf16.mxu0 %v1000_v45 }
  0x2b   :  { %860 = vmatpush3.bf16.msra.mxu0 %v1001_v46 }
  0x2c   :  { %861 = vmatprep.subr.bf16.mxu0 %v1002_v47  ;;  %899 = vmatmul.mubr.msk.bf16.vlgmr.msra.gmra.mrb[4].mxu1 %vm424_vm1, %v25_v57 }
  0x2d   :  { %934 = vmatprep.mubr.msk.f32.mxu1 %vm1018_vm0, %v1017_v44  ;;  %939 = vmatpush3.bf16.msra.mxu1 %v803_v0 }
  0x2e   :  { %940 = vmatprep.subr.bf16.mxu1 %v1019_v1 }
  0x2f   :  { %862 = vmatpush3.bf16.msra.mxu0 %v1003_v48 }
  0x30   :  { %863 = vmatprep.subr.bf16.mxu0 %v1004_v49 }
  0x31   :  { %942 = vmatpush3.bf16.msra.mxu1 %v804_v2 }
  0x32   :  { %943 = vmatprep.subr.bf16.mxu1 %v1019_v1 }
  0x33   :  { %864 = vmatpush3.bf16.msra.mxu0 %v1005_v50 }
  0x34   :  { %865 = vmatprep.subr.bf16.mxu0 %v1006_v51 }
  0x35   :  { %945 = vmatpush3.bf16.msra.mxu1 %v805_v3 }
  0x36   :  { %946 = vmatprep.subr.bf16.mxu1 %v1019_v1 }
  0x37   :  { %866 = vmatpush3.bf16.msra.mxu0 %v1007_v56 }
  0x38   :  { %867 = vmatprep.subr.bf16.mxu0 %v1008_v58 }
  0x39   :  { %948 = vmatpush3.bf16.msra.mxu1 %v806_v4 }
  0x3a   :  { %949 = vmatprep.subr.bf16.mxu1 %v1019_v1 }
  0x3b   :  { %868 = vmatpush3.bf16.msra.mxu0 %v1009_v59 }
  0x3c   :  { %869 = vmatprep.subr.bf16.mxu0 %v1010_v60 }
  0x3d   :  { %951 = vmatpush3.bf16.msra.mxu1 %v807_v5 }
  0x3e   :  { %952 = vmatprep.subr.bf16.mxu1 %v1019_v1 }
  0x3f   :  { %870 = vmatpush3.bf16.msra.mxu0 %v1011_v61 }
  0x41   :  { %954 = vmatpush3.bf16.msra.mxu1 %v808_v6 }
  0x42   :  { %541 = vmatmul.mubr.bf16.vlgmr.msra.gmra.mrb[4].mxu0 %v23_v63  ;;  %955 = vmatprep.subr.bf16.mxu1 %v1019_v1 }
  0x45   :  { %957 = vmatpush3.bf16.msra.mxu1 %v809_v8 }
  0x46   :  { %958 = vmatprep.subr.bf16.mxu1 %v1019_v1 }
  0x49   :  { %960 = vmatpush3.bf16.msra.mxu1 %v810_v10 }
  0xf5   :  { %v827_v16 = vpop.f32.mrb[0].mxu0 }
  0xf6   :  { %v828_v18 = vpop.f32.mrb[1].mxu0 }
  0xf7   :  { %v829_v19 = vadd.f32 %v828_v18, %v827_v16  ;;  %v830_v20 = vpop.f32.mrb[2].mxu0  ;;  %v849_v21 = vpop.f32.mrb[0].mxu1 }
  0xf8   :  { %v831_v22 = vpop.f32.mrb[3].mxu0  ;;  %v850_v24 = vpop.f32.mrb[1].mxu1 }
  0xf9   :  { %v463_v23 = vadd.f32 %v829_v19, %v129_v17  ;;  %v851_v25 = vadd.f32 %v850_v24, %v849_v21  ;;  %v852_v26 = vpop.f32.mrb[2].mxu1 }
  0xfa   :  { %v853_v27 = vpop.f32.mrb[3].mxu1 }
  0xfb   :  { %v503_v28 = vadd.f32 %v851_v25, %v463_v23 }
  0xff   :  { %v582_v29 = vpop.f32.mrb[4].mxu1 }
 0x100   :  { %v900_v30 = vpop.f32.mrb[5].mxu1 }
 0x101   :  { %v585_v31 = vpop.f32.mrb[6].mxu1 }
 0x102   :  { %v901_v32 = vpop.f32.mrb[7].mxu1 }
 0x115   :  { %v871_v33 = vpop.f32.mrb[4].mxu0 }
 0x116   :  { %v872_v34 = vpop.f32.mrb[5].mxu0 }
 0x117   :  { %v873_v35 = vadd.f32 %v872_v34, %v871_v33  ;;  %v874_v36 = vpop.f32.mrb[6].mxu0 }
 0x118   :  { %v875_v37 = vpop.f32.mrb[7].mxu0 }
 0x119   :  { %v543_v38 = vadd.f32 %v873_v35, %v503_v28 }
 0x11b   :  { %v583_v39 = vadd.f32 %v582_v29, %v543_v38 }
 0x11d   :  { %v588_v40 = vmax.f32 %v583_v39, 0.0 }
 0x11f   :  { %935 = vmatmul.mubr.f32.vlgmr.msra.gmra.mrb[8].mxu1 %v588_v40 }
 0x1f2   :  { %v693_v42 = vpop.f32.mrb[8].mxu1 }
 0x1f3   :  { %v694_v44 = vadd.f32 %v693_v42, %v626_v14  ;;  %v936_v45 = vpop.f32.mrb[9].mxu1 }
 0x1f5   :  { %v702_v46 = vsel %vm1232_vm4, %v694_v44, -inf }
 0x1f6   :  { %703 = vmax.xlane.f32.xlu0 %v702_v46 }
 0x283   :  { %v704_v47 = vpop.xlane.xlu0 %703 }
 0x284   :  { %v705_v48 = vsub.f32 %v694_v44, %v704_v47 }
 0x286   :  { %v706_v49 = vmul.f32 1.442695, %v705_v48 }
 0x288   :  { %1013 = vpow2.f32 %v706_v49 }
 0x292   :  { %v1014_v50 = vpop.eup %1013 }
 0x293   :  { %v708_v51 = vsel %vm1232_vm4, %v1014_v50, 0.0 }
 0x294   :  { %709 = vadd.xlane.f32.xlu0 %v708_v51 }
 0x321   :  { %v710_v52 = vpop.xlane.xlu0 %709 }
 0x322   :  { %1015 = vrcp.f32 %v710_v52 }
 0x32c   :  { %v1016_v53 = vpop.eup %1015 }
 0x32d   :  { %v712_v54 = vmul.f32 %v1016_v53, %v708_v51 }
 0x32f   :  { %v713_v55 = vmul.f32 32.0, %v712_v54 }
 0x331   :  { %v714_v56 = vadd.f32 1e-06, %v713_v55 }
 0x333   :  { %v715_v57 = vsel %vm1232_vm4, %v714_v56, %v694_v44 }
 0x334   :  { %716 = vst [vmem:[%s1247_s2] sm:$0xff] %v715_v57 }

</bundles_post_ra>
